<compile_context>
chip_gen: v6e
topology: v6e:2x2x1
jax: 0.10.0
libtpu: 0.0.40
codegen_flags: <defaults>
</compile_context>

<pallas_src>
import math

import jax
import jax.numpy as jnp
from jax.experimental import pallas as pl
from jax.experimental.pallas import tpu as pltpu


def _round_up(x, m):
    return (x + m - 1) // m * m


def _erf(x):
    # Abramowitz & Stegun 7.1.26 rational approximation (max abs err ~1.5e-7).
    a1, a2, a3, a4, a5 = (0.254829592, -0.284496736, 1.421413741,
                          -1.453152027, 1.061405429)
    p = 0.3275911
    ax = jnp.abs(x)
    t = 1.0 / (1.0 + p * ax)
    poly = ((((a5 * t + a4) * t + a3) * t + a2) * t + a1) * t
    y = 1.0 - poly * jnp.exp(-ax * ax)
    return jnp.where(x < 0.0, -y, y)


def _gelu_exact(x):
    return 0.5 * x * (1.0 + _erf(x * (1.0 / math.sqrt(2.0))))


def _embed_fc_kernel(x_ref, w1_ref, b1_ref, w2_ref, b2_ref, o_ref):
    """Fused Linear -> GELU -> Linear on one row tile (all f32, two MXU dots)."""
    h = jnp.dot(x_ref[...], w1_ref[...], preferred_element_type=jnp.float32)
    h = _gelu_exact(h + b1_ref[...])
    o = jnp.dot(h, w2_ref[...], preferred_element_type=jnp.float32)
    o_ref[...] = (o + b2_ref[...]).astype(o_ref.dtype)


def embed_fc(x, params, *, row_tile=1024):
    """Forward of EmbedFC: x.view(-1, input_dim) -> Linear -> GELU -> Linear.

    Weights are stored as [in, out] (transposed vs torch's [out, in]).
    Returns [M, emb_dim] with M = x.size / input_dim.
    """
    w1, b1, w2, b2 = params["w1"], params["b1"], params["w2"], params["b2"]
    d_in, emb = w1.shape

    x2 = x.reshape(-1, d_in).astype(jnp.float32)   # == torch x.view(-1, input_dim)
    m = x2.shape[0]

    # --- lane-dense HIDDEN padding only (multiple of 128 lanes), inert math --
    # Padded W1 columns / b1 entries are zero, GELU(0)=0, and the matching
    # padded W2 rows are zero, so the output (kept at true width `emb`) is
    # unchanged.  Output-side padding + wrapper slice are intentionally gone.
    emb_p = _round_up(emb, 128)
    pe = emb_p - emb
    if pe:
        w1 = jnp.pad(w1, ((0, 0), (0, pe)))
        b1 = jnp.pad(b1, ((0, 0), (0, pe)))
        w2 = jnp.pad(w2, ((0, pe), (0, 0)))     # contraction rows only

    # --- row tiling: tm is always a multiple of 8; no row padding of x -------
    tm = _round_up(min(row_tile, m), 8)
    grid = (pl.cdiv(m, tm),)                    # ragged last block is masked

    # --- VMEM budget computed from the actual footprint ----------------------
    d_in_lane = _round_up(d_in, 128)
    emb_lane = _round_up(emb, 128)
    weight_bytes = (_round_up(d_in, 8) * emb_p      # W1
                    + 8 * emb_p                     # b1 (sublane-padded)
                    + emb_p * emb_lane              # W2
                    + 8 * emb_lane) * 4             # b2
    io_bytes = 2 * tm * (d_in_lane + emb_lane) * 4  # double-buffered x/out tiles
    scratch_bytes = 4 * tm * emb_p * 4              # hidden h + GELU temporaries
    footprint = 2 * weight_bytes + io_bytes + scratch_bytes
    try:
        vmem_cap = int(pltpu.get_tpu_info().vmem_capacity_bytes * 3 // 4)
    except Exception:
        vmem_cap = 48 * 1024 * 1024                 # safe on v5e/v6e/v7x
    vmem_limit = int(min(max(2 * footprint, 32 * 1024 * 1024), vmem_cap))

    def build_call(single_buffer_weights):
        if single_buffer_weights:
            # Constant-index blocks: single-buffer to reclaim VMEM (v7x).
            def wspec(shape):
                return pl.BlockSpec(shape, lambda i: (0, 0),
                                    pipeline_mode=pl.Buffered(1))
        else:
            def wspec(shape):
                return pl.BlockSpec(shape, lambda i: (0, 0))

        return pl.pallas_call(
            _embed_fc_kernel,
            out_shape=jax.ShapeDtypeStruct((m, emb), jnp.float32),
            grid=grid,
            in_specs=[
                pl.BlockSpec((tm, d_in), lambda i: (i, 0)),  # x row tile (pipelined)
                wspec((d_in, emb_p)),                        # W1 (VMEM-resident)
                wspec((1, emb_p)),                           # b1
                wspec((emb_p, emb)),                         # W2
                wspec((1, emb)),                             # b2
            ],
            out_specs=pl.BlockSpec((tm, emb), lambda i: (i, 0)),
            compiler_params=pltpu.CompilerParams(
                dimension_semantics=("parallel",),  # v7x: row tiles split over 2 TCs
                vmem_limit_bytes=vmem_limit,
            ),
        )

    try:
        out = build_call(single_buffer_weights=True)(x2, w1, b1, w2, b2)
    except Exception:
        # Fallback for jax versions / lowerings without pipeline_mode support.
        out = build_call(single_buffer_weights=False)(x2, w1, b1, w2, b2)

    return out


def init_params(key, input_dim, emb_dim):
    """torch nn.Linear default init: W, b ~ U(-1/sqrt(fan_in), 1/sqrt(fan_in))."""
    k1, k2, k3, k4 = jax.random.split(key, 4)

    def linear_init(kw, kb, fin, fout):
        bound = 1.0 / math.sqrt(fin)
        w = jax.random.uniform(kw, (fin, fout), jnp.float32, -bound, bound)
        b = jax.random.uniform(kb, (1, fout), jnp.float32, -bound, bound)
        return w, b

    w1, b1 = linear_init(k1, k2, input_dim, emb_dim)
    w2, b2 = linear_init(k3, k4, emb_dim, emb_dim)
    return {"w1": w1, "b1": b1, "w2": w2, "b2": b2}


if __name__ == "__main__":
    key = jax.random.PRNGKey(0)
    kx, kp = jax.random.split(key)

    input_dim, emb_dim = 4, 32
    # Any leading shape works; forward flattens to (-1, input_dim) -> 12 rows,
    # which with row_tile=8 exercises grid > 1 AND the ragged last block.
    x = jax.random.normal(kx, (3, 2, 2, input_dim), jnp.float32)
    params = init_params(kp, input_dim, emb_dim)

    out = embed_fc(x, params, row_tile=8)
    out = jax.block_until_ready(out)

    # Pure-JAX reference (exact erf GELU, matches torch.nn.GELU default).
    x2 = x.reshape(-1, input_dim)
    h = jax.nn.gelu(x2 @ params["w1"] + params["b1"], approximate=False)
    ref = h @ params["w2"] + params["b2"]

    assert out.shape == (x2.shape[0], emb_dim), out.shape
    assert bool(jnp.all(jnp.isfinite(out)))
    err = float(jnp.max(jnp.abs(out - ref)))
    assert err < 1e-4, err
    print("KERNEL_OK")
</pallas_src>

<mosaic_0001>
module attributes {stable_mosaic.version = 11 : i64} {
  func.func @_embed_fc_kernel(%arg0: i32, %arg1: memref<8x4xf32, #tpu.memory_space<vmem>>, %arg2: memref<4x128xf32, #tpu.memory_space<vmem>>, %arg3: memref<1x128xf32, #tpu.memory_space<vmem>>, %arg4: memref<128x32xf32, #tpu.memory_space<vmem>>, %arg5: memref<1x32xf32, #tpu.memory_space<vmem>>, %arg6: memref<8x32xf32, #tpu.memory_space<vmem>>) attributes {dimension_semantics = [#tpu.dimension_semantics<parallel>], iteration_bounds = array<i64: 2>, scalar_prefetch = 0 : i64, scratch_operands = 0 : i64, tpu.core_type = #tpu.core_type<tc>, window_params = [{transform_indices = @transform_0, window_bounds = array<i64: 8, 4>}, {pipeline_mode = #tpu.pipeline_mode<synchronous>, transform_indices = @transform_1, window_bounds = array<i64: 4, 128>}, {pipeline_mode = #tpu.pipeline_mode<synchronous>, transform_indices = @transform_2, window_bounds = array<i64: 1, 128>}, {pipeline_mode = #tpu.pipeline_mode<synchronous>, transform_indices = @transform_3, window_bounds = array<i64: 128, 32>}, {pipeline_mode = #tpu.pipeline_mode<synchronous>, transform_indices = @transform_4, window_bounds = array<i64: 1, 32>}, {transform_indices = @transform_5, window_bounds = array<i64: 8, 32>}]} {
    %c0 = arith.constant 0 : index
    %c0_0 = arith.constant 0 : index
    %0 = vector.load %arg1[%c0, %c0_0] : memref<8x4xf32, #tpu.memory_space<vmem>>, vector<8x4xf32>
    %c0_1 = arith.constant 0 : index
    %c0_2 = arith.constant 0 : index
    %1 = vector.load %arg2[%c0_1, %c0_2] : memref<4x128xf32, #tpu.memory_space<vmem>>, vector<4x128xf32>
    %cst = arith.constant dense<0.000000e+00> : vector<8x128xf32>
    %2 = tpu.matmul %0, %1, %cst {dimension_numbers = #tpu.dot_dimension_numbers<[1], [0], [0], [1], [0, 0, 1, 1], [], []>} : vector<8x4xf32>, vector<4x128xf32>, vector<8x128xf32> -> vector<8x128xf32>
    %c0_3 = arith.constant 0 : index
    %c0_4 = arith.constant 0 : index
    %3 = vector.load %arg3[%c0_3, %c0_4] : memref<1x128xf32, #tpu.memory_space<vmem>>, vector<1x128xf32>
    %4 = vector.broadcast %3 : vector<1x128xf32> to vector<8x128xf32>
    %5 = arith.addf %2, %4 : vector<8x128xf32>
    %cst_5 = arith.constant 5.000000e-01 : f32
    %6 = vector.broadcast %cst_5 : f32 to vector<8x128xf32>
    %7 = arith.mulf %6, %5 : vector<8x128xf32>
    %cst_6 = arith.constant 0.707106769 : f32
    %8 = vector.broadcast %cst_6 : f32 to vector<8x128xf32>
    %9 = arith.mulf %5, %8 : vector<8x128xf32>
    %10 = math.absf %9 : vector<8x128xf32>
    %cst_7 = arith.constant 0.327591091 : f32
    %11 = vector.broadcast %cst_7 : f32 to vector<8x128xf32>
    %12 = arith.mulf %11, %10 : vector<8x128xf32>
    %cst_8 = arith.constant 1.000000e+00 : f32
    %13 = vector.broadcast %cst_8 : f32 to vector<8x128xf32>
    %14 = arith.addf %13, %12 : vector<8x128xf32>
    %cst_9 = arith.constant 1.000000e+00 : f32
    %15 = vector.broadcast %cst_9 : f32 to vector<8x128xf32>
    %16 = arith.divf %15, %14 : vector<8x128xf32>
    %cst_10 = arith.constant 1.06140542 : f32
    %17 = vector.broadcast %cst_10 : f32 to vector<8x128xf32>
    %18 = arith.mulf %17, %16 : vector<8x128xf32>
    %cst_11 = arith.constant -1.45315206 : f32
    %19 = vector.broadcast %cst_11 : f32 to vector<8x128xf32>
    %20 = arith.addf %18, %19 : vector<8x128xf32>
    %21 = arith.mulf %20, %16 : vector<8x128xf32>
    %cst_12 = arith.constant 1.42141378 : f32
    %22 = vector.broadcast %cst_12 : f32 to vector<8x128xf32>
    %23 = arith.addf %21, %22 : vector<8x128xf32>
    %24 = arith.mulf %23, %16 : vector<8x128xf32>
    %cst_13 = arith.constant -0.284496725 : f32
    %25 = vector.broadcast %cst_13 : f32 to vector<8x128xf32>
    %26 = arith.addf %24, %25 : vector<8x128xf32>
    %27 = arith.mulf %26, %16 : vector<8x128xf32>
    %cst_14 = arith.constant 0.254829586 : f32
    %28 = vector.broadcast %cst_14 : f32 to vector<8x128xf32>
    %29 = arith.addf %27, %28 : vector<8x128xf32>
    %30 = arith.mulf %29, %16 : vector<8x128xf32>
    %cst_15 = arith.constant 0.000000e+00 : f32
    %31 = vector.broadcast %cst_15 : f32 to vector<8x128xf32>
    %32 = arith.subf %31, %10 : vector<8x128xf32>
    %33 = arith.mulf %32, %10 : vector<8x128xf32>
    %34 = math.exp %33 : vector<8x128xf32>
    %35 = arith.mulf %30, %34 : vector<8x128xf32>
    %cst_16 = arith.constant 1.000000e+00 : f32
    %36 = vector.broadcast %cst_16 : f32 to vector<8x128xf32>
    %37 = arith.subf %36, %35 : vector<8x128xf32>
    %cst_17 = arith.constant 0.000000e+00 : f32
    %38 = vector.broadcast %cst_17 : f32 to vector<8x128xf32>
    %39 = arith.cmpf olt, %9, %38 : vector<8x128xf32>
    %cst_18 = arith.constant 0.000000e+00 : f32
    %40 = vector.broadcast %cst_18 : f32 to vector<8x128xf32>
    %41 = arith.subf %40, %37 : vector<8x128xf32>
    %42 = arith.select %39, %41, %37 : vector<8x128xi1>, vector<8x128xf32>
    %cst_19 = arith.constant 1.000000e+00 : f32
    %43 = vector.broadcast %cst_19 : f32 to vector<8x128xf32>
    %44 = arith.addf %43, %42 : vector<8x128xf32>
    %45 = arith.mulf %7, %44 : vector<8x128xf32>
    %c0_20 = arith.constant 0 : index
    %c0_21 = arith.constant 0 : index
    %46 = vector.load %arg4[%c0_20, %c0_21] : memref<128x32xf32, #tpu.memory_space<vmem>>, vector<128x32xf32>
    %cst_22 = arith.constant dense<0.000000e+00> : vector<8x32xf32>
    %47 = tpu.matmul %45, %46, %cst_22 {dimension_numbers = #tpu.dot_dimension_numbers<[1], [0], [0], [1], [0, 0, 1, 1], [], []>} : vector<8x128xf32>, vector<128x32xf32>, vector<8x32xf32> -> vector<8x32xf32>
    %c0_23 = arith.constant 0 : index
    %c0_24 = arith.constant 0 : index
    %48 = vector.load %arg5[%c0_23, %c0_24] : memref<1x32xf32, #tpu.memory_space<vmem>>, vector<1x32xf32>
    %49 = vector.broadcast %48 : vector<1x32xf32> to vector<8x32xf32>
    %50 = arith.addf %47, %49 : vector<8x32xf32>
    %c0_25 = arith.constant 0 : index
    %c0_26 = arith.constant 0 : index
    %51 = vector.load %arg6[%c0_25, %c0_26] : memref<8x32xf32, #tpu.memory_space<vmem>>, vector<8x32xf32>
    tpu.vector_store %arg6[%c0_25, %c0_26], %50 {strides = array<i32>} : memref<8x32xf32, #tpu.memory_space<vmem>>, vector<8x32xf32>,
    return
  }
  func.func @transform_0(%arg0: i32) -> (i32, i32) {
    %c0_i32 = arith.constant 0 : i32
    %c0_i32_0 = arith.constant 0 : i32
    return %arg0, %c0_i32 : i32, i32
  }
  func.func @transform_1(%arg0: i32) -> (i32, i32) {
    %c0_i32 = arith.constant 0 : i32
    %c0_i32_0 = arith.constant 0 : i32
    %c0_i32_1 = arith.constant 0 : i32
    return %c0_i32, %c0_i32_0 : i32, i32
  }
  func.func @transform_2(%arg0: i32) -> (i32, i32) {
    %c0_i32 = arith.constant 0 : i32
    %c0_i32_0 = arith.constant 0 : i32
    %c0_i32_1 = arith.constant 0 : i32
    return %c0_i32, %c0_i32_0 : i32, i32
  }
  func.func @transform_3(%arg0: i32) -> (i32, i32) {
    %c0_i32 = arith.constant 0 : i32
    %c0_i32_0 = arith.constant 0 : i32
    %c0_i32_1 = arith.constant 0 : i32
    return %c0_i32, %c0_i32_0 : i32, i32
  }
  func.func @transform_4(%arg0: i32) -> (i32, i32) {
    %c0_i32 = arith.constant 0 : i32
    %c0_i32_0 = arith.constant 0 : i32
    %c0_i32_1 = arith.constant 0 : i32
    return %c0_i32, %c0_i32_0 : i32, i32
  }
  func.func @transform_5(%arg0: i32) -> (i32, i32) {
    %c0_i32 = arith.constant 0 : i32
    %c0_i32_0 = arith.constant 0 : i32
    return %arg0, %c0_i32 : i32, i32
  }
}

module attributes {stable_mosaic.version = 11 : i64} {
  func.func @_embed_fc_kernel(%arg0: i32, %arg1: memref<8x4xf32, #tpu.memory_space<vmem>>, %arg2: memref<4x128xf32, #tpu.memory_space<vmem>>, %arg3: memref<1x128xf32, #tpu.memory_space<vmem>>, %arg4: memref<128x32xf32, #tpu.memory_space<vmem>>, %arg5: memref<1x32xf32, #tpu.memory_space<vmem>>, %arg6: memref<8x32xf32, #tpu.memory_space<vmem>>) attributes {dimension_semantics = [#tpu.dimension_semantics<parallel>], iteration_bounds = array<i64: 2>, scalar_prefetch = 0 : i64, scratch_operands = 0 : i64, tpu.core_type = #tpu.core_type<tc>, window_params = [{transform_indices = @transform_0, window_bounds = array<i64: 8, 4>}, {pipeline_mode = #tpu.pipeline_mode<synchronous>, transform_indices = @transform_1, window_bounds = array<i64: 4, 128>}, {pipeline_mode = #tpu.pipeline_mode<synchronous>, transform_indices = @transform_2, window_bounds = array<i64: 1, 128>}, {pipeline_mode = #tpu.pipeline_mode<synchronous>, transform_indices = @transform_3, window_bounds = array<i64: 128, 32>}, {pipeline_mode = #tpu.pipeline_mode<synchronous>, transform_indices = @transform_4, window_bounds = array<i64: 1, 32>}, {transform_indices = @transform_5, window_bounds = array<i64: 8, 32>}]} {
    %c0 = arith.constant 0 : index
    %c0_0 = arith.constant 0 : index
    %0 = vector.load %arg1[%c0, %c0_0] : memref<8x4xf32, #tpu.memory_space<vmem>>, vector<8x4xf32>
    %c0_1 = arith.constant 0 : index
    %c0_2 = arith.constant 0 : index
    %1 = vector.load %arg2[%c0_1, %c0_2] : memref<4x128xf32, #tpu.memory_space<vmem>>, vector<4x128xf32>
    %cst = arith.constant dense<0.000000e+00> : vector<8x128xf32>
    %2 = tpu.matmul %0, %1, %cst {dimension_numbers = #tpu.dot_dimension_numbers<[1], [0], [0], [1], [0, 0, 1, 1], [], []>} : vector<8x4xf32>, vector<4x128xf32>, vector<8x128xf32> -> vector<8x128xf32>
    %c0_3 = arith.constant 0 : index
    %c0_4 = arith.constant 0 : index
    %3 = vector.load %arg3[%c0_3, %c0_4] : memref<1x128xf32, #tpu.memory_space<vmem>>, vector<1x128xf32>
    %4 = vector.broadcast %3 : vector<1x128xf32> to vector<8x128xf32>
    %5 = arith.addf %2, %4 : vector<8x128xf32>
    %cst_5 = arith.constant 5.000000e-01 : f32
    %6 = vector.broadcast %cst_5 : f32 to vector<8x128xf32>
    %7 = arith.mulf %6, %5 : vector<8x128xf32>
    %cst_6 = arith.constant 0.707106769 : f32
    %8 = vector.broadcast %cst_6 : f32 to vector<8x128xf32>
    %9 = arith.mulf %5, %8 : vector<8x128xf32>
    %10 = math.absf %9 : vector<8x128xf32>
    %cst_7 = arith.constant 0.327591091 : f32
    %11 = vector.broadcast %cst_7 : f32 to vector<8x128xf32>
    %12 = arith.mulf %11, %10 : vector<8x128xf32>
    %cst_8 = arith.constant 1.000000e+00 : f32
    %13 = vector.broadcast %cst_8 : f32 to vector<8x128xf32>
    %14 = arith.addf %13, %12 : vector<8x128xf32>
    %cst_9 = arith.constant 1.000000e+00 : f32
    %15 = vector.broadcast %cst_9 : f32 to vector<8x128xf32>
    %16 = arith.divf %15, %14 : vector<8x128xf32>
    %cst_10 = arith.constant 1.06140542 : f32
    %17 = vector.broadcast %cst_10 : f32 to vector<8x128xf32>
    %18 = arith.mulf %17, %16 : vector<8x128xf32>
    %cst_11 = arith.constant -1.45315206 : f32
    %19 = vector.broadcast %cst_11 : f32 to vector<8x128xf32>
    %20 = arith.addf %18, %19 : vector<8x128xf32>
    %21 = arith.mulf %20, %16 : vector<8x128xf32>
    %cst_12 = arith.constant 1.42141378 : f32
    %22 = vector.broadcast %cst_12 : f32 to vector<8x128xf32>
    %23 = arith.addf %21, %22 : vector<8x128xf32>
    %24 = arith.mulf %23, %16 : vector<8x128xf32>
    %cst_13 = arith.constant -0.284496725 : f32
    %25 = vector.broadcast %cst_13 : f32 to vector<8x128xf32>
    %26 = arith.addf %24, %25 : vector<8x128xf32>
    %27 = arith.mulf %26, %16 : vector<8x128xf32>
    %cst_14 = arith.constant 0.254829586 : f32
    %28 = vector.broadcast %cst_14 : f32 to vector<8x128xf32>
    %29 = arith.addf %27, %28 : vector<8x128xf32>
    %30 = arith.mulf %29, %16 : vector<8x128xf32>
    %cst_15 = arith.constant 0.000000e+00 : f32
    %31 = vector.broadcast %cst_15 : f32 to vector<8x128xf32>
    %32 = arith.subf %31, %10 : vector<8x128xf32>
    %33 = arith.mulf %32, %10 : vector<8x128xf32>
    %34 = math.exp %33 : vector<8x128xf32>
    %35 = arith.mulf %30, %34 : vector<8x128xf32>
    %cst_16 = arith.constant 1.000000e+00 : f32
    %36 = vector.broadcast %cst_16 : f32 to vector<8x128xf32>
    %37 = arith.subf %36, %35 : vector<8x128xf32>
    %cst_17 = arith.constant 0.000000e+00 : f32
    %38 = vector.broadcast %cst_17 : f32 to vector<8x128xf32>
    %39 = arith.cmpf olt, %9, %38 : vector<8x128xf32>
    %cst_18 = arith.constant 0.000000e+00 : f32
    %40 = vector.broadcast %cst_18 : f32 to vector<8x128xf32>
    %41 = arith.subf %40, %37 : vector<8x128xf32>
    %42 = arith.select %39, %41, %37 : vector<8x128xi1>, vector<8x128xf32>
    %cst_19 = arith.constant 1.000000e+00 : f32
    %43 = vector.broadcast %cst_19 : f32 to vector<8x128xf32>
    %44 = arith.addf %43, %42 : vector<8x128xf32>
    %45 = arith.mulf %7, %44 : vector<8x128xf32>
    %c0_20 = arith.constant 0 : index
    %c0_21 = arith.constant 0 : index
    %46 = vector.load %arg4[%c0_20, %c0_21] : memref<128x32xf32, #tpu.memory_space<vmem>>, vector<128x32xf32>
    %cst_22 = arith.constant dense<0.000000e+00> : vector<8x32xf32>
    %47 = tpu.matmul %45, %46, %cst_22 {dimension_numbers = #tpu.dot_dimension_numbers<[1], [0], [0], [1], [0, 0, 1, 1], [], []>} : vector<8x128xf32>, vector<128x32xf32>, vector<8x32xf32> -> vector<8x32xf32>
    %c0_23 = arith.constant 0 : index
    %c0_24 = arith.constant 0 : index
    %48 = vector.load %arg5[%c0_23, %c0_24] : memref<1x32xf32, #tpu.memory_space<vmem>>, vector<1x32xf32>
    %49 = vector.broadcast %48 : vector<1x32xf32> to vector<8x32xf32>
    %50 = arith.addf %47, %49 : vector<8x32xf32>
    %c0_25 = arith.constant 0 : index
    %c0_26 = arith.constant 0 : index
    %51 = vector.load %arg6[%c0_25, %c0_26] : memref<8x32xf32, #tpu.memory_space<vmem>>, vector<8x32xf32>
    tpu.vector_store %arg6[%c0_25, %c0_26], %50 {strides = array<i32>} : memref<8x32xf32, #tpu.memory_space<vmem>>, vector<8x32xf32>,
    return
  }
  func.func @transform_0(%arg0: i32) -> (i32, i32) {
    %c0_i32 = arith.constant 0 : i32
    %c0_i32_0 = arith.constant 0 : i32
    return %arg0, %c0_i32 : i32, i32
  }
  func.func @transform_1(%arg0: i32) -> (i32, i32) {
    %c0_i32 = arith.constant 0 : i32
    %c0_i32_0 = arith.constant 0 : i32
    %c0_i32_1 = arith.constant 0 : i32
    return %c0_i32, %c0_i32_0 : i32, i32
  }
  func.func @transform_2(%arg0: i32) -> (i32, i32) {
    %c0_i32 = arith.constant 0 : i32
    %c0_i32_0 = arith.constant 0 : i32
    %c0_i32_1 = arith.constant 0 : i32
    return %c0_i32, %c0_i32_0 : i32, i32
  }
  func.func @transform_3(%arg0: i32) -> (i32, i32) {
    %c0_i32 = arith.constant 0 : i32
    %c0_i32_0 = arith.constant 0 : i32
    %c0_i32_1 = arith.constant 0 : i32
    return %c0_i32, %c0_i32_0 : i32, i32
  }
  func.func @transform_4(%arg0: i32) -> (i32, i32) {
    %c0_i32 = arith.constant 0 : i32
    %c0_i32_0 = arith.constant 0 : i32
    %c0_i32_1 = arith.constant 0 : i32
    return %c0_i32, %c0_i32_0 : i32, i32
  }
  func.func @transform_5(%arg0: i32) -> (i32, i32) {
    %c0_i32 = arith.constant 0 : i32
    %c0_i32_0 = arith.constant 0 : i32
    return %arg0, %c0_i32 : i32, i32
  }
}

</mosaic_0001>

<bundles_post_ra>
// kernel: tpu_custom_call.1
= control target key start
LH: loop header
LB: loop body
LE: loop exit
PB: predicated region body
PF: predicated region fallthrough
CT: control target
= control target key end

     0   :  { %10 = vsyncpa [#allocation3], 0  ;;  %s865_s0 = inlined_call_operand.vmem [shape: f32[12,4], index: 0, kind: input, shape index: {}]   ;;  %s866_s1 = inlined_call_operand.vmem [shape: f32[4,128], index: 1, kind: input, shape index: {}]   ;;  %s867_s2 = inlined_call_operand.vmem [shape: f32[1,128], index: 2, kind: input, shape index: {}]   ;;  %s868_s3 = inlined_call_operand.vmem [shape: f32[128,32], index: 3, kind: input, shape index: {}]   ;;  %s869_s4 = inlined_call_operand.vmem [shape: f32[1,32], index: 4, kind: input, shape index: {}]   ;;  %s870_s5 = inlined_call_operand.hbm [shape: f32[12,32], index: 5, kind: output, shape index: {}]  }
   0x1   :  { %12 = vsyncpa [#allocation3 + $0x1], 0  ;;  %s715_s18 = smov 0   ;;  %s717_s19 = smov 0  }
   0x2   :  { %s719_s20 = smov 0   ;;  %s721_s21 = smov 0  }
   0x3 LB: > { %s736_s22 = sadd.s32 4294967295, %s680_s21   ;;  %s502_s23 = sadd.s32 4294967294, %s680_s21   ;;  %s680_s21 = sphi %s721_s21, %s876_s21   ;;  %s676_s20 = sphi %s719_s20, %s875_s20   ;;  %s672_s19 = sphi %s717_s19, %s874_s19   ;;  %s668_s18 = sphi %s715_s18, %s873_s18  }
   0x4   : > { %s740_s24 = sadd.s32 1, %s680_s21   ;;  %s135_s25 = sadd.s32 1, %s676_s20 }
   0x5   : > { %s132_s26 = ssub.s32 %s680_s21, %s740_s24  ;;  %p145_p0 = scmp.ne.s32.totalorder %s676_s20, %s672_s19 }
   0x6   : > { %p133_p1 = scmp.eq.s32.totalorder %s132_s26, 0  ;;  %p146_p2 = scmp.eq.s32.totalorder %s736_s22, 1 }
   0x7   : > { %p151_p3 = scmp.ne.s32.totalorder %s672_s19, %s668_s18  ;;  %p152_p4 = scmp.eq.s32.totalorder %s502_s23, 1 }
   0x8   : > { %s751_s27 = scalar_select %p133_p1, %s676_s20, %s135_s25  }
   0x9   : > { %p753_p5 = por %p146_p2, %p145_p0  ;;  %p757_p6 = por %p152_p4, %p151_p3 }
   0xa   : > { %p505_p7 = scmp.ge.s32.totalorder %s680_s21, 1  ;;  %p189_p8 = scmp.lt.s32.totalorder %s680_s21, 3 }
   0xc   : > { %p190_p9 = pnand %p505_p7, %p189_p8 }
   0xd   : > { %p216_p10 = scmp.lt.s32.totalorder (!%p190_p9), %s736_s22, 1  ;;  %s213_s14 = sand.u32 (!%p190_p9), 1, %s672_s19  }
   0xe   : > { %193 = sbr.rel (%p190_p9) target bundleno = 478 (0x1de), region = 40  ;;  %s506_s15 = sshll.u32 (!%p190_p9), %s213_s14, 3 }
   0xf   : > { %s513_s23 = sshll.u32 (!%p190_p9), %s736_s22, 7  ;;  %s215_s25 = scalar_lea.vmem (!%p190_p9), [#allocation2], %s506_s15 }
  0x10   : > { %s443_s26 = sshll.u32 (!%p190_p9), %s215_s25, 4  ;;  %s444_s26 = int_to_ptr.vmem [resolvable:$true] %s443_s26 }
  0x11   : > { %s620_s9 = scalar_lea.vmem (!%p190_p9), %s444_s26, 128 }
  0x12   : > { %p621_p11 = scmp.ne.s32.totalorder (!%p190_p9), %s444_s26, %s620_s9 }
  0x13   : > { %v221_v0 = vld [vmem:[%s866_s1] sm:$0xf]  ;;  %vm233_vm0 = vcmask 1043456   ;;  %v682_v1 = vmov 0.0   ;;  %vm683_vm1 = vmmov 0   ;;  %s217_s7 = scalar_select %p216_p10, %s736_s22, 1 }
  0x14   : > { %535 = vmatprep.subr.mxu0 %v682_v1  ;;  %537 = vmatprep.mubr.msk.f32.mxu0 %vm683_vm1, %v682_v1  ;;  %vm229_vm2 = vcmask 31744   ;;  %v349_v3 = vld [vmem:[%s868_s3 + $0x78] sm:$0xff]  ;;  %v348_v4 = vld [vmem:[%s868_s3 + $0x70] sm:$0xff]  ;;  %v347_v5 = vld [vmem:[%s868_s3 + $0x68] sm:$0xff]  ;;  %vm427_vm4 = vcmask 261120   ;;  %p622_p12 = pnand %p621_p11, %p753_p5  ;;  %s684_s22 = smov [#allocation2]  }
  0x15   : > { %536 = vmatpush3.msk.msra.mxu0 %vm233_vm0, %v221_v0  ;;  %540 = vmatprep.subr.mxu1 %v682_v1  ;;  %s507_s8 = sshll.u32 %s217_s7, 3  ;;  %v346_v6 = vld [vmem:[%s868_s3 + $0x60] sm:$0xff]  ;;  %v345_v7 = vld [vmem:[%s868_s3 + $0x58] sm:$0xff]  ;;  %v344_v8 = vld [vmem:[%s868_s3 + $0x50] sm:$0xff]  ;;  %s830_s7 = scalar_lea.hbm %s870_s5, %s513_s23 }
  0x16   : > { %572 = vmatprep.mubr.msk.f32.mxu1 %vm683_vm1, %v682_v1  ;;  %s219_s11 = scalar_lea.vmem %s865_s0, %s507_s8  ;;  %541 = vmatpush3.msra.mxu1 %v349_v3  ;;  %v343_v9 = vld [vmem:[%s868_s3 + $0x48] sm:$0xff]  ;;  %v342_v10 = vld [vmem:[%s868_s3 + $0x40] sm:$0xff]  ;;  %v341_v11 = vld [vmem:[%s868_s3 + $0x38] sm:$0xff]  ;;  %s430_s8 = scalar_lea.sflag [#allocation3], %s213_s14 }
  0x17   : > { %v220_v2 = vld [vmem:[%s219_s11] sm:$0xff]  ;;  %542 = vmatprep.subr.mxu1 %v682_v1  ;;  %v340_v12 = vld [vmem:[%s868_s3 + $0x30] sm:$0xff]  ;;  %v339_v13 = vld [vmem:[%s868_s3 + $0x28] sm:$0xff]  ;;  %p623_p13 = pneg %p622_p12  ;;  %s624_s10 = sshll.u32 %s684_s22, 4  ;;  %s625_s10 = int_to_ptr.vmem [resolvable:$false] %s624_s10 }
  0x18   : > { %538 = vmatmul.mubr.msk.f32.vlgmr.msra.gmra.mxu0 %vm229_vm2, %v220_v2  ;;  %543 = vmatpush3.msra.mxu1 %v348_v4  ;;  %v338_v14 = vld [vmem:[%s868_s3 + $0x20] sm:$0xff]  ;;  %v337_v15 = vld [vmem:[%s868_s3 + $0x18] sm:$0xff]  ;;  %v336_v16 = vld [vmem:[%s868_s3 + $0x10] sm:$0xff]  ;;  %s626_s11 = scalar_lea.vmem %s625_s10, 256  ;;  %p627_p0 = scmp.lt.s32.totalorder %s444_s26, %s625_s10 }
  0x19   : > { %544 = vmatprep.subr.mxu1 %v682_v1  ;;  %v335_v17 = vld [vmem:[%s868_s3 + $0x8] sm:$0xff]  ;;  %v334_v18 = vld [vmem:[%s868_s3] sm:$0xff]  ;;  %p628_p1 = scmp.lt.s32.totalorder %s626_s11, %s620_s9 }
  0x1a   : > { %545 = vmatpush3.msra.mxu1 %v347_v5  ;;  %v508_v19 = vld [vmem:[%s867_s2] ss:$0 sm:$0xff] }
  0x1b   : > { %546 = vmatprep.subr.mxu1 %v682_v1  ;;  %v511_v48 = vld [vmem:[%s869_s4] ss:$0 sm:$0xff]  ;;  %p629_p2 = por %p628_p1, %p627_p0 }
  0x1c   : > { %547 = vmatpush3.msra.mxu1 %v346_v6 }
  0x1d   : > { %548 = vmatprep.subr.mxu1 %v682_v1  ;;  %p630_p3 = pnand %p629_p2, %p623_p13 }
  0x1e   : > { %549 = vmatpush3.msra.mxu1 %v345_v7 }
  0x1f   : > { %550 = vmatprep.subr.mxu1 %v682_v1 }
  0x20   : > { %551 = vmatpush3.msra.mxu1 %v344_v8 }
  0x21   : > { %552 = vmatprep.subr.mxu1 %v682_v1 }
  0x22   : > { %553 = vmatpush3.msra.mxu1 %v343_v9 }
  0x23   : > { %554 = vmatprep.subr.mxu1 %v682_v1 }
  0x24   : > { %555 = vmatpush3.msra.mxu1 %v342_v10 }
  0x25   : > { %556 = vmatprep.subr.mxu1 %v682_v1 }
  0x26   : > { %557 = vmatpush3.msra.mxu1 %v341_v11 }
  0x27   : > { %558 = vmatprep.subr.mxu1 %v682_v1 }
  0x28   : > { %559 = vmatpush3.msra.mxu1 %v340_v12 }
  0x29   : > { %560 = vmatprep.subr.mxu1 %v682_v1 }
  0x2a   : > { %561 = vmatpush3.msra.mxu1 %v339_v13 }
  0x2b   : > { %562 = vmatprep.subr.mxu1 %v682_v1 }
  0x2c   : > { %563 = vmatpush3.msra.mxu1 %v338_v14 }
  0x2d   : > { %564 = vmatprep.subr.mxu1 %v682_v1 }
  0x2e   : > { %565 = vmatpush3.msra.mxu1 %v337_v15 }
  0x2f   : > { %566 = vmatprep.subr.mxu1 %v682_v1 }
  0x30   : > { %567 = vmatpush3.msra.mxu1 %v336_v16 }
  0x31   : > { %568 = vmatprep.subr.mxu1 %v682_v1 }
  0x32   : > { %569 = vmatpush3.msra.mxu1 %v335_v17 }
  0x33   : > { %570 = vmatprep.subr.mxu1 %v682_v1 }
  0x34   : > { %571 = vmatpush3.msra.mxu1 %v334_v18 }
  0xd8   : > { %v303_v20 = vpop.f32.mrf.mxu0 }
  0xd9   : > { %v304_v21 = vadd.f32 %v508_v19, %v303_v20 }
  0xda   : > { %v539_v22 = vpop.f32.mrf.mxu0 }
  0xdb   : > { %v308_v23 = vmul.f32 0.70710677, %v304_v21  ;;  %v307_v45 = vmul.f32 0.5, %v304_v21 }
  0xdd   : > { %v309_v24 = vand.u32 2147483647, %v308_v23  ;;  %vm329_vm3 = vcmp.lt.f32.partialorder %v308_v23, 0.0 }
  0xdf   : > { %v310_v25 = vmul.f32 0.3275911, %v309_v24  ;;  %v323_v27 = vsub.f32 0.0, %v309_v24 }
  0xe1   : > { %v311_v26 = vadd.f32 1.0, %v310_v25  ;;  %v324_v28 = vmul.f32 %v323_v27, %v309_v24 }
  0xe3   : > { %616 = vrcp.f32 %v311_v26  ;;  %v325_v30 = vmul.f32 1.442695, %v324_v28 }
  0xe5   : > { %618 = vpow2.f32 %v325_v30 }
  0xf0   : > { %v617_v29 = vpop.eup %616 }
  0xf1   : > { %v314_v31 = vmul.f32 1.0614054, %v617_v29 }
  0xf2   : > { %v619_v40 = vpop.eup %618 }
  0xf3   : > { %v315_v32 = vadd.f32 -1.4531521, %v314_v31 }
  0xf5   : > { %v316_v33 = vmul.f32 %v617_v29, %v315_v32 }
  0xf7   : > { %v317_v34 = vadd.f32 1.4214138, %v316_v33 }
  0xf9   : > { %v318_v35 = vmul.f32 %v617_v29, %v317_v34 }
  0xfb   : > { %v319_v36 = vadd.f32 -0.28449672, %v318_v35 }
  0xfd   : > { %v320_v37 = vmul.f32 %v617_v29, %v319_v36 }
  0xff   : > { %v321_v38 = vadd.f32 0.2548296, %v320_v37 }
 0x101   : > { %v322_v39 = vmul.f32 %v617_v29, %v321_v38 }
 0x103   : > { %v327_v41 = vmul.f32 %v619_v40, %v322_v39 }
 0x105   : > { %v328_v42 = vsub.f32 1.0, %v327_v41 }
 0x107   : > { %v330_v43 = vsub.f32 0.0, %v328_v42 }
 0x109   : > { %v331_v44 = vsel %vm329_vm3, %v330_v43, %v328_v42 }
 0x10a   : > { %v332_v46 = vadd.f32 1.0, %v331_v44 }
 0x10c   : > { %v333_v47 = vmul.f32 %v332_v46, %v307_v45 }
 0x10e   : > { %573 = vmatmul.mubr.f32.vlgmr.msra.gmra.mxu1 %v333_v47 }
 0x1ce   : > { %v423_v49 = vpop.f32.mrf.mxu1 }
 0x1cf   : > { %v424_v50 = vadd.f32 %v511_v48, %v423_v49 }
 0x1d0   : > { %v574_v51 = vpop.f32.mrf.mxu1 }
 0x1d1   : > { %428 = vst.msk [vmem:[%s215_s25] sm:$0xff] %vm427_vm4, %v424_v50 }
 0x1d2   : > { %633 = shalt.err (!%p630_p3)
}
 0x1d3   : > { %s634_s12 = scalar_lea.hbm %s830_s7, 128  ;;  %s638_s15 = scalar_lea.hbm %s870_s5, 256 }
 0x1d4   : > { %p635_p4 = scmp.ne.s32.totalorder %s830_s7, %s634_s12  ;;  %p639_p9 = scmp.lt.s32.totalorder %s830_s7, %s870_s5 }
 0x1d5   : > { %p640_p10 = scmp.lt.s32.totalorder %s638_s15, %s634_s12 }
 0x1d6   : > { %p636_p7 = pnand %p635_p4, %p753_p5 }
 0x1d7   : > { %p641_p11 = por %p640_p10, %p639_p9 }
 0x1d8   : > { %p637_p8 = pneg %p636_p7 }
 0x1da   : > { %p642_p12 = pnand %p641_p11, %p637_p8 }
 0x1dc   : > { %645 = shalt.err (!%p642_p12)
}
 0x1dd   : > { %575 = dma.vmem_to_hbm [thread:$0]  (%p753_p5), %s444_s26, 128, %s830_s7, %s430_s8  }
 0x1de PF: > { %p581_p13 = scmp.ge.s32.totalorder %s680_s21, 2  ;;  %s455_s23 = sand.u32 1, %s668_s18  }
 0x1df   : > { %s456_s25 = scalar_lea.sflag [#allocation3], %s455_s23 }
 0x1e0   : > { %p578_p0 = pnand %p581_p13, %p757_p6 }
 0x1e2   : > { %p579_p1 = pneg %p578_p0 }
 0x1e4   : > { %663 = dma.done.wait (%p579_p1), %s456_s25, 128  }
 0x1e5   : > { %665 = vsyncadd (%p579_p1), %s456_s25, 4294967168  ;;  %p15_p2 = scmp.ge.s32.totalorder %s740_s24, 4   ;;  %s873_s18 = smov %s672_s19 }
 0x1e6   : > { %s874_s19 = smov %s676_s20  ;;  %s875_s20 = smov %s751_s27 }
 0x1e7   : > { %s876_s21 = smov %s740_s24  ;;  %17 = sbr.rel (!%p15_p2) target bundleno = 3 (0x3), region = 75 }
 0x1ec   :  { %461 = vsyncpa [#allocation3], 1 }
 0x1ed   :  { %463 = vsyncpa [#allocation3 + $0x1], 1 }

// kernel: tpu_custom_call.1
= control target key start
LH: loop header
LB: loop body
LE: loop exit
PB: predicated region body
PF: predicated region fallthrough
CT: control target
= control target key end

     0   :  { %10 = vsyncpa [#allocation3], 0  ;;  %s865_s0 = inlined_call_operand.vmem [shape: f32[12,4], index: 0, kind: input, shape index: {}]   ;;  %s866_s1 = inlined_call_operand.vmem [shape: f32[4,128], index: 1, kind: input, shape index: {}]   ;;  %s867_s2 = inlined_call_operand.vmem [shape: f32[1,128], index: 2, kind: input, shape index: {}]   ;;  %s868_s3 = inlined_call_operand.vmem [shape: f32[128,32], index: 3, kind: input, shape index: {}]   ;;  %s869_s4 = inlined_call_operand.vmem [shape: f32[1,32], index: 4, kind: input, shape index: {}]   ;;  %s870_s5 = inlined_call_operand.hbm [shape: f32[12,32], index: 5, kind: output, shape index: {}]  }
   0x1   :  { %12 = vsyncpa [#allocation3 + $0x1], 0  ;;  %s715_s18 = smov 0   ;;  %s717_s19 = smov 0  }
   0x2   :  { %s719_s20 = smov 0   ;;  %s721_s21 = smov 0  }
   0x3 LB: > { %s736_s22 = sadd.s32 4294967295, %s680_s21   ;;  %s502_s23 = sadd.s32 4294967294, %s680_s21   ;;  %s680_s21 = sphi %s721_s21, %s876_s21   ;;  %s676_s20 = sphi %s719_s20, %s875_s20   ;;  %s672_s19 = sphi %s717_s19, %s874_s19   ;;  %s668_s18 = sphi %s715_s18, %s873_s18  }
   0x4   : > { %s740_s24 = sadd.s32 1, %s680_s21   ;;  %s135_s25 = sadd.s32 1, %s676_s20 }
   0x5   : > { %s132_s26 = ssub.s32 %s680_s21, %s740_s24  ;;  %p145_p0 = scmp.ne.s32.totalorder %s676_s20, %s672_s19 }
   0x6   : > { %p133_p1 = scmp.eq.s32.totalorder %s132_s26, 0  ;;  %p146_p2 = scmp.eq.s32.totalorder %s736_s22, 1 }
   0x7   : > { %p151_p3 = scmp.ne.s32.totalorder %s672_s19, %s668_s18  ;;  %p152_p4 = scmp.eq.s32.totalorder %s502_s23, 1 }
   0x8   : > { %s751_s27 = scalar_select %p133_p1, %s676_s20, %s135_s25  }
   0x9   : > { %p753_p5 = por %p146_p2, %p145_p0  ;;  %p757_p6 = por %p152_p4, %p151_p3 }
   0xa   : > { %p505_p7 = scmp.ge.s32.totalorder %s680_s21, 1  ;;  %p189_p8 = scmp.lt.s32.totalorder %s680_s21, 3 }
   0xc   : > { %p190_p9 = pnand %p505_p7, %p189_p8 }
   0xd   : > { %p216_p10 = scmp.lt.s32.totalorder (!%p190_p9), %s736_s22, 1  ;;  %s213_s14 = sand.u32 (!%p190_p9), 1, %s672_s19  }
   0xe   : > { %193 = sbr.rel (%p190_p9) target bundleno = 478 (0x1de), region = 40  ;;  %s506_s15 = sshll.u32 (!%p190_p9), %s213_s14, 3 }
   0xf   : > { %s513_s23 = sshll.u32 (!%p190_p9), %s736_s22, 7  ;;  %s215_s25 = scalar_lea.vmem (!%p190_p9), [#allocation2], %s506_s15 }
  0x10   : > { %s443_s26 = sshll.u32 (!%p190_p9), %s215_s25, 4  ;;  %s444_s26 = int_to_ptr.vmem [resolvable:$true] %s443_s26 }
  0x11   : > { %s620_s9 = scalar_lea.vmem (!%p190_p9), %s444_s26, 128 }
  0x12   : > { %p621_p11 = scmp.ne.s32.totalorder (!%p190_p9), %s444_s26, %s620_s9 }
  0x13   : > { %v221_v0 = vld [vmem:[%s866_s1] sm:$0xf]  ;;  %vm233_vm0 = vcmask 1043456   ;;  %v682_v1 = vmov 0.0   ;;  %vm683_vm1 = vmmov 0   ;;  %s217_s7 = scalar_select %p216_p10, %s736_s22, 1 }
  0x14   : > { %535 = vmatprep.subr.mxu0 %v682_v1  ;;  %537 = vmatprep.mubr.msk.f32.mxu0 %vm683_vm1, %v682_v1  ;;  %vm229_vm2 = vcmask 31744   ;;  %v349_v3 = vld [vmem:[%s868_s3 + $0x78] sm:$0xff]  ;;  %v348_v4 = vld [vmem:[%s868_s3 + $0x70] sm:$0xff]  ;;  %v347_v5 = vld [vmem:[%s868_s3 + $0x68] sm:$0xff]  ;;  %vm427_vm4 = vcmask 261120   ;;  %p622_p12 = pnand %p621_p11, %p753_p5  ;;  %s684_s22 = smov [#allocation2]  }
  0x15   : > { %536 = vmatpush3.msk.msra.mxu0 %vm233_vm0, %v221_v0  ;;  %540 = vmatprep.subr.mxu1 %v682_v1  ;;  %s507_s8 = sshll.u32 %s217_s7, 3  ;;  %v346_v6 = vld [vmem:[%s868_s3 + $0x60] sm:$0xff]  ;;  %v345_v7 = vld [vmem:[%s868_s3 + $0x58] sm:$0xff]  ;;  %v344_v8 = vld [vmem:[%s868_s3 + $0x50] sm:$0xff]  ;;  %s830_s7 = scalar_lea.hbm %s870_s5, %s513_s23 }
  0x16   : > { %572 = vmatprep.mubr.msk.f32.mxu1 %vm683_vm1, %v682_v1  ;;  %s219_s11 = scalar_lea.vmem %s865_s0, %s507_s8  ;;  %541 = vmatpush3.msra.mxu1 %v349_v3  ;;  %v343_v9 = vld [vmem:[%s868_s3 + $0x48] sm:$0xff]  ;;  %v342_v10 = vld [vmem:[%s868_s3 + $0x40] sm:$0xff]  ;;  %v341_v11 = vld [vmem:[%s868_s3 + $0x38] sm:$0xff]  ;;  %s430_s8 = scalar_lea.sflag [#allocation3], %s213_s14 }
  0x17   : > { %v220_v2 = vld [vmem:[%s219_s11] sm:$0xff]  ;;  %542 = vmatprep.subr.mxu1 %v682_v1  ;;  %v340_v12 = vld [vmem:[%s868_s3 + $0x30] sm:$0xff]  ;;  %v339_v13 = vld [vmem:[%s868_s3 + $0x28] sm:$0xff]  ;;  %p623_p13 = pneg %p622_p12  ;;  %s624_s10 = sshll.u32 %s684_s22, 4  ;;  %s625_s10 = int_to_ptr.vmem [resolvable:$false] %s624_s10 }
  0x18   : > { %538 = vmatmul.mubr.msk.f32.vlgmr.msra.gmra.mxu0 %vm229_vm2, %v220_v2  ;;  %543 = vmatpush3.msra.mxu1 %v348_v4  ;;  %v338_v14 = vld [vmem:[%s868_s3 + $0x20] sm:$0xff]  ;;  %v337_v15 = vld [vmem:[%s868_s3 + $0x18] sm:$0xff]  ;;  %v336_v16 = vld [vmem:[%s868_s3 + $0x10] sm:$0xff]  ;;  %s626_s11 = scalar_lea.vmem %s625_s10, 256  ;;  %p627_p0 = scmp.lt.s32.totalorder %s444_s26, %s625_s10 }
  0x19   : > { %544 = vmatprep.subr.mxu1 %v682_v1  ;;  %v335_v17 = vld [vmem:[%s868_s3 + $0x8] sm:$0xff]  ;;  %v334_v18 = vld [vmem:[%s868_s3] sm:$0xff]  ;;  %p628_p1 = scmp.lt.s32.totalorder %s626_s11, %s620_s9 }
  0x1a   : > { %545 = vmatpush3.msra.mxu1 %v347_v5  ;;  %v508_v19 = vld [vmem:[%s867_s2] ss:$0 sm:$0xff] }
  0x1b   : > { %546 = vmatprep.subr.mxu1 %v682_v1  ;;  %v511_v48 = vld [vmem:[%s869_s4] ss:$0 sm:$0xff]  ;;  %p629_p2 = por %p628_p1, %p627_p0 }
  0x1c   : > { %547 = vmatpush3.msra.mxu1 %v346_v6 }
  0x1d   : > { %548 = vmatprep.subr.mxu1 %v682_v1  ;;  %p630_p3 = pnand %p629_p2, %p623_p13 }
  0x1e   : > { %549 = vmatpush3.msra.mxu1 %v345_v7 }
  0x1f   : > { %550 = vmatprep.subr.mxu1 %v682_v1 }
  0x20   : > { %551 = vmatpush3.msra.mxu1 %v344_v8 }
  0x21   : > { %552 = vmatprep.subr.mxu1 %v682_v1 }
  0x22   : > { %553 = vmatpush3.msra.mxu1 %v343_v9 }
  0x23   : > { %554 = vmatprep.subr.mxu1 %v682_v1 }
  0x24   : > { %555 = vmatpush3.msra.mxu1 %v342_v10 }
  0x25   : > { %556 = vmatprep.subr.mxu1 %v682_v1 }
  0x26   : > { %557 = vmatpush3.msra.mxu1 %v341_v11 }
  0x27   : > { %558 = vmatprep.subr.mxu1 %v682_v1 }
  0x28   : > { %559 = vmatpush3.msra.mxu1 %v340_v12 }
  0x29   : > { %560 = vmatprep.subr.mxu1 %v682_v1 }
  0x2a   : > { %561 = vmatpush3.msra.mxu1 %v339_v13 }
  0x2b   : > { %562 = vmatprep.subr.mxu1 %v682_v1 }
  0x2c   : > { %563 = vmatpush3.msra.mxu1 %v338_v14 }
  0x2d   : > { %564 = vmatprep.subr.mxu1 %v682_v1 }
  0x2e   : > { %565 = vmatpush3.msra.mxu1 %v337_v15 }
  0x2f   : > { %566 = vmatprep.subr.mxu1 %v682_v1 }
  0x30   : > { %567 = vmatpush3.msra.mxu1 %v336_v16 }
  0x31   : > { %568 = vmatprep.subr.mxu1 %v682_v1 }
  0x32   : > { %569 = vmatpush3.msra.mxu1 %v335_v17 }
  0x33   : > { %570 = vmatprep.subr.mxu1 %v682_v1 }
  0x34   : > { %571 = vmatpush3.msra.mxu1 %v334_v18 }
  0xd8   : > { %v303_v20 = vpop.f32.mrf.mxu0 }
  0xd9   : > { %v304_v21 = vadd.f32 %v508_v19, %v303_v20 }
  0xda   : > { %v539_v22 = vpop.f32.mrf.mxu0 }
  0xdb   : > { %v308_v23 = vmul.f32 0.70710677, %v304_v21  ;;  %v307_v45 = vmul.f32 0.5, %v304_v21 }
  0xdd   : > { %v309_v24 = vand.u32 2147483647, %v308_v23  ;;  %vm329_vm3 = vcmp.lt.f32.partialorder %v308_v23, 0.0 }
  0xdf   : > { %v310_v25 = vmul.f32 0.3275911, %v309_v24  ;;  %v323_v27 = vsub.f32 0.0, %v309_v24 }
  0xe1   : > { %v311_v26 = vadd.f32 1.0, %v310_v25  ;;  %v324_v28 = vmul.f32 %v323_v27, %v309_v24 }
  0xe3   : > { %616 = vrcp.f32 %v311_v26  ;;  %v325_v30 = vmul.f32 1.442695, %v324_v28 }
  0xe5   : > { %618 = vpow2.f32 %v325_v30 }
  0xf0   : > { %v617_v29 = vpop.eup %616 }
  0xf1   : > { %v314_v31 = vmul.f32 1.0614054, %v617_v29 }
  0xf2   : > { %v619_v40 = vpop.eup %618 }
  0xf3   : > { %v315_v32 = vadd.f32 -1.4531521, %v314_v31 }
  0xf5   : > { %v316_v33 = vmul.f32 %v617_v29, %v315_v32 }
  0xf7   : > { %v317_v34 = vadd.f32 1.4214138, %v316_v33 }
  0xf9   : > { %v318_v35 = vmul.f32 %v617_v29, %v317_v34 }
  0xfb   : > { %v319_v36 = vadd.f32 -0.28449672, %v318_v35 }
  0xfd   : > { %v320_v37 = vmul.f32 %v617_v29, %v319_v36 }
  0xff   : > { %v321_v38 = vadd.f32 0.2548296, %v320_v37 }
 0x101   : > { %v322_v39 = vmul.f32 %v617_v29, %v321_v38 }
 0x103   : > { %v327_v41 = vmul.f32 %v619_v40, %v322_v39 }
 0x105   : > { %v328_v42 = vsub.f32 1.0, %v327_v41 }
 0x107   : > { %v330_v43 = vsub.f32 0.0, %v328_v42 }
 0x109   : > { %v331_v44 = vsel %vm329_vm3, %v330_v43, %v328_v42 }
 0x10a   : > { %v332_v46 = vadd.f32 1.0, %v331_v44 }
 0x10c   : > { %v333_v47 = vmul.f32 %v332_v46, %v307_v45 }
 0x10e   : > { %573 = vmatmul.mubr.f32.vlgmr.msra.gmra.mxu1 %v333_v47 }
 0x1ce   : > { %v423_v49 = vpop.f32.mrf.mxu1 }
 0x1cf   : > { %v424_v50 = vadd.f32 %v511_v48, %v423_v49 }
 0x1d0   : > { %v574_v51 = vpop.f32.mrf.mxu1 }
 0x1d1   : > { %428 = vst.msk [vmem:[%s215_s25] sm:$0xff] %vm427_vm4, %v424_v50 }
 0x1d2   : > { %633 = shalt.err (!%p630_p3)
}
 0x1d3   : > { %s634_s12 = scalar_lea.hbm %s830_s7, 128  ;;  %s638_s15 = scalar_lea.hbm %s870_s5, 256 }
 0x1d4   : > { %p635_p4 = scmp.ne.s32.totalorder %s830_s7, %s634_s12  ;;  %p639_p9 = scmp.lt.s32.totalorder %s830_s7, %s870_s5 }
 0x1d5   : > { %p640_p10 = scmp.lt.s32.totalorder %s638_s15, %s634_s12 }
 0x1d6   : > { %p636_p7 = pnand %p635_p4, %p753_p5 }
 0x1d7   : > { %p641_p11 = por %p640_p10, %p639_p9 }
 0x1d8   : > { %p637_p8 = pneg %p636_p7 }
 0x1da   : > { %p642_p12 = pnand %p641_p11, %p637_p8 }
 0x1dc   : > { %645 = shalt.err (!%p642_p12)
}
 0x1dd   : > { %575 = dma.vmem_to_hbm [thread:$0]  (%p753_p5), %s444_s26, 128, %s830_s7, %s430_s8  }
 0x1de PF: > { %p581_p13 = scmp.ge.s32.totalorder %s680_s21, 2  ;;  %s455_s23 = sand.u32 1, %s668_s18  }
 0x1df   : > { %s456_s25 = scalar_lea.sflag [#allocation3], %s455_s23 }
 0x1e0   : > { %p578_p0 = pnand %p581_p13, %p757_p6 }
 0x1e2   : > { %p579_p1 = pneg %p578_p0 }
 0x1e4   : > { %663 = dma.done.wait (%p579_p1), %s456_s25, 128  }
 0x1e5   : > { %665 = vsyncadd (%p579_p1), %s456_s25, 4294967168  ;;  %p15_p2 = scmp.ge.s32.totalorder %s740_s24, 4   ;;  %s873_s18 = smov %s672_s19 }
 0x1e6   : > { %s874_s19 = smov %s676_s20  ;;  %s875_s20 = smov %s751_s27 }
 0x1e7   : > { %s876_s21 = smov %s740_s24  ;;  %17 = sbr.rel (!%p15_p2) target bundleno = 3 (0x3), region = 75 }
 0x1ec   :  { %461 = vsyncpa [#allocation3], 1 }
 0x1ed   :  { %463 = vsyncpa [#allocation3 + $0x1], 1 }

</bundles_post_ra>
